<compile_context>
chip_gen: v7x
topology: tpu7x:2x2x1
jax: 0.10.0
libtpu: 0.0.40
codegen_flags: <defaults>
</compile_context>

<pallas_src>
import functools

import jax
import jax.numpy as jnp
import numpy as np
from jax.experimental import pallas as pl
from jax.experimental.pallas import tpu as pltpu


# ---------------------------------------------------------------------------
# Pallas kernel (whole network, single invocation)
# ---------------------------------------------------------------------------
def fused_discriminator_kernel(*refs, dilations, T, downsample):
    """All TemporalBlocks + final Linear.

    refs = (x, per-layer [w1c, w1p, b1, w2c, w2p, b2, (wd, bd)], fc_w, fc_b, out)
    """
    out_ref = refs[-1]
    BT = refs[0].shape[0]

    # Row index -> time index within its batch element (hoisted: computed once).
    t_row = jax.lax.broadcasted_iota(jnp.int32, (BT, 1), 0) % T

    def dot(a, b):
        return jnp.dot(a, b, preferred_element_type=jnp.float32)

    h = refs[0][...].astype(jnp.float32)                 # (B*T, C_in)
    i = 1
    for li, d in enumerate(dilations):
        w1c = refs[i][...]       # (Cin,  Cout)   tap k=1 (current sample)
        w1p = refs[i + 1][...]   # (Cin,  Cout)   tap k=0 (sample t-d)
        b1 = refs[i + 2][...]    # (1, Cout)
        w2c = refs[i + 3][...]   # (Cout, Cout)
        w2p = refs[i + 4][...]   # (Cout, Cout)
        b2 = refs[i + 5][...]    # (1, Cout)
        i += 6

        # Zero rows with t < d: covers both the causal zero-padding and the
        # rows that would leak across the flattened batch boundary.
        maskf = (t_row >= d).astype(jnp.float32)         # (B*T, 1), lane bcast

        def causal_shift(v, d=d, maskf=maskf):
            # out[b*T + t] = v[b*T + t - d] for t >= d, else 0.
            shifted = jnp.concatenate(
                [jnp.zeros((d, v.shape[1]), v.dtype), v[: BT - d, :]], axis=0)
            return shifted * maskf

        x = h
        # conv1 + chomp + relu   (dropout = identity in eval mode)
        h1 = jnp.maximum(dot(x, w1c) + dot(causal_shift(x), w1p) + b1, 0.0)
        # conv2 + chomp + relu
        h2 = jnp.maximum(dot(h1, w2c) + dot(causal_shift(h1), w2p) + b2, 0.0)

        if downsample[li]:                               # 1x1 conv residual (Cin != Cout)
            wd = refs[i][...]                            # (Cin, Cout)
            bd = refs[i + 1][...]                        # (1, Cout)
            i += 2
            res = dot(x, wd) + bd
        else:                                            # identity residual: no matmul
            res = x
        h = jnp.maximum(h2 + res, 0.0)

    # Final fcc: (B*T, H) @ (H, O) + b   (activate_function is None -> identity)
    fc_w = refs[i][...]
    fc_b = refs[i + 1][...]
    y = dot(h, fc_w) + fc_b
    # TODO(synk): output_dim=1 -> lane-masked store; negligible since only
    # B*T floats are written once from the single fused kernel.
    out_ref[...] = y.astype(out_ref.dtype)


# ---------------------------------------------------------------------------
# Wrapper: one pallas_call, everything resident in VMEM
# ---------------------------------------------------------------------------
def discriminator_forward(X, params):
    B, T, Cin = X.shape
    blocks = params["blocks"]
    dilations = tuple(2 ** i for i in range(len(blocks)))
    downsample = tuple("wd" in blk for blk in blocks)
    O = params["fc_w"].shape[1]

    inputs = [X.reshape(B * T, Cin).astype(jnp.float32)]
    for blk in blocks:
        inputs += [blk["w1c"], blk["w1p"], blk["b1"],
                   blk["w2c"], blk["w2p"], blk["b2"]]
        if "wd" in blk:
            inputs += [blk["wd"], blk["bd"]]
    inputs += [params["fc_w"], params["fc_b"]]

    kernel = functools.partial(
        fused_discriminator_kernel,
        dilations=dilations, T=T, downsample=downsample)

    y = pl.pallas_call(
        kernel,
        out_shape=jax.ShapeDtypeStruct((B * T, O), jnp.float32),
        in_specs=[pl.BlockSpec(memory_space=pltpu.MemorySpace.VMEM)
                  for _ in inputs],
        out_specs=pl.BlockSpec(memory_space=pltpu.MemorySpace.VMEM),
    )(*inputs)
    return y.reshape(B, T, O)


# ---------------------------------------------------------------------------
# Deterministic synthetic parameter init (mirrors module __init__ shapes)
# ---------------------------------------------------------------------------
def init_discriminator(key, input_size, hidden_dim, num_layers, output_dim):
    blocks = []
    for i in range(num_layers):
        cin = input_size if i == 0 else hidden_dim
        cout = hidden_dim
        key, k1, k2, k3, k4, k5, k6 = jax.random.split(key, 7)
        # Conv1d weights: (Cout, Cin, K=2).  weight_norm at init => effective == v.
        w1 = jax.random.normal(k1, (cout, cin, 2), jnp.float32) * 0.1
        b1 = jax.random.normal(k2, (cout,), jnp.float32) * 0.1
        w2 = jax.random.normal(k3, (cout, cout, 2), jnp.float32) * 0.1
        b2 = jax.random.normal(k4, (cout,), jnp.float32) * 0.1
        blk = dict(
            w1c=w1[:, :, 1].T,               # (Cin, Cout) multiplies x[t]
            w1p=w1[:, :, 0].T,               # (Cin, Cout) multiplies x[t-d]
            b1=b1.reshape(1, cout),
            w2c=w2[:, :, 1].T,
            w2p=w2[:, :, 0].T,
            b2=b2.reshape(1, cout),
        )
        if cin != cout:  # downsample 1x1 conv only when channel count changes
            wd = jax.random.normal(k5, (cout, cin), jnp.float32) * 0.1
            bd = jax.random.normal(k6, (cout,), jnp.float32) * 0.1
            blk["wd"] = wd.T                 # (Cin, Cout)
            blk["bd"] = bd.reshape(1, cout)
        blocks.append(blk)
    key, kf1, kf2 = jax.random.split(key, 3)
    fc_w = jax.random.normal(kf1, (hidden_dim, output_dim), jnp.float32) * 0.1
    fc_b = jax.random.normal(kf2, (1, output_dim), jnp.float32) * 0.1
    return dict(blocks=blocks, fc_w=fc_w, fc_b=fc_b)


# ---------------------------------------------------------------------------
# Pure-JAX reference (for correctness check)
# ---------------------------------------------------------------------------
def reference_forward(X, params):
    h = X.astype(jnp.float32)
    T = X.shape[1]
    for i, blk in enumerate(params["blocks"]):
        d = 2 ** i
        shift = lambda v, d=d: jnp.pad(v, ((0, 0), (d, 0), (0, 0)))[:, :T, :]
        h1 = jnp.maximum(h @ blk["w1c"] + shift(h) @ blk["w1p"] + blk["b1"], 0.0)
        h2 = jnp.maximum(h1 @ blk["w2c"] + shift(h1) @ blk["w2p"] + blk["b2"], 0.0)
        res = (h @ blk["wd"] + blk["bd"]) if "wd" in blk else h
        h = jnp.maximum(h2 + res, 0.0)
    return h @ params["fc_w"] + params["fc_b"]


if __name__ == "__main__":
    # Small config consistent with the module's forward:
    #   Discriminator(time_stamp=16, input_size=8, hidden_dim=12, output_dim=1, num_layers=3)
    B, T, C_IN, HID, OUT, LAYERS = 2, 16, 8, 12, 1, 3

    key = jax.random.PRNGKey(0)
    key, kx = jax.random.split(key)
    X = jax.random.normal(kx, (B, T, C_IN), jnp.float32)

    params = init_discriminator(key, C_IN, HID, LAYERS, OUT)

    fwd = jax.jit(discriminator_forward)
    out = jax.block_until_ready(fwd(X, params))
    ref = jax.block_until_ready(reference_forward(X, params))

    assert out.shape == (B, T, OUT), out.shape
    np.testing.assert_allclose(np.asarray(out), np.asarray(ref), rtol=2e-5, atol=2e-5)

    print("KERNEL_OK")
</pallas_src>

<mosaic_0001>
module attributes {stable_mosaic.version = 11 : i64} {
  func.func @fused_discriminator_kernel(%arg0: memref<32x8xf32, #tpu.memory_space<vmem>>, %arg1: memref<8x12xf32, #tpu.memory_space<vmem>>, %arg2: memref<8x12xf32, #tpu.memory_space<vmem>>, %arg3: memref<1x12xf32, #tpu.memory_space<vmem>>, %arg4: memref<12x12xf32, #tpu.memory_space<vmem>>, %arg5: memref<12x12xf32, #tpu.memory_space<vmem>>, %arg6: memref<1x12xf32, #tpu.memory_space<vmem>>, %arg7: memref<8x12xf32, #tpu.memory_space<vmem>>, %arg8: memref<1x12xf32, #tpu.memory_space<vmem>>, %arg9: memref<12x12xf32, #tpu.memory_space<vmem>>, %arg10: memref<12x12xf32, #tpu.memory_space<vmem>>, %arg11: memref<1x12xf32, #tpu.memory_space<vmem>>, %arg12: memref<12x12xf32, #tpu.memory_space<vmem>>, %arg13: memref<12x12xf32, #tpu.memory_space<vmem>>, %arg14: memref<1x12xf32, #tpu.memory_space<vmem>>, %arg15: memref<12x12xf32, #tpu.memory_space<vmem>>, %arg16: memref<12x12xf32, #tpu.memory_space<vmem>>, %arg17: memref<1x12xf32, #tpu.memory_space<vmem>>, %arg18: memref<12x12xf32, #tpu.memory_space<vmem>>, %arg19: memref<12x12xf32, #tpu.memory_space<vmem>>, %arg20: memref<1x12xf32, #tpu.memory_space<vmem>>, %arg21: memref<12x1xf32, #tpu.memory_space<vmem>>, %arg22: memref<1x1xf32, #tpu.memory_space<vmem>>, %arg23: memref<32x1xf32, #tpu.memory_space<vmem>>) attributes {dimension_semantics = [], scalar_prefetch = 0 : i64, scratch_operands = 0 : i64, tpu.core_type = #tpu.core_type<tc>} {
    %0 = tpu.iota {dimensions = array<i32: 0>} : vector<32x1xi32>
    %c16_i32 = arith.constant 16 : i32
    %c0_i32 = arith.constant 0 : i32
    %1 = arith.cmpi eq, %c16_i32, %c0_i32 : i32
    %c1_i32 = arith.constant 1 : i32
    %2 = arith.select %1, %c1_i32, %c16_i32 : i32
    %3 = vector.broadcast %2 : i32 to vector<32x1xi32>
    %4 = arith.remsi %0, %3 : vector<32x1xi32>
    %c0_i32_0 = arith.constant 0 : i32
    %5 = vector.broadcast %c0_i32_0 : i32 to vector<32x1xi32>
    %6 = arith.cmpi ne, %4, %5 : vector<32x1xi32>
    %c0_i32_1 = arith.constant 0 : i32
    %7 = vector.broadcast %c0_i32_1 : i32 to vector<32x1xi32>
    %8 = arith.cmpi slt, %4, %7 : vector<32x1xi32>
    %c0_i32_2 = arith.constant 0 : i32
    %9 = arith.cmpi slt, %2, %c0_i32_2 : i32
    %10 = vector.broadcast %9 : i1 to vector<32x1xi1>
    %11 = vector.broadcast %10 : vector<32x1xi1> to vector<32x1xi1>
    %12 = arith.xori %8, %11 : vector<32x1xi1>
    %13 = arith.andi %12, %6 : vector<32x1xi1>
    %14 = vector.broadcast %2 : i32 to vector<32x1xi32>
    %15 = arith.addi %4, %14 : vector<32x1xi32>
    %16 = arith.select %13, %15, %4 : vector<32x1xi1>, vector<32x1xi32>
    %c0 = arith.constant 0 : index
    %c0_3 = arith.constant 0 : index
    %17 = vector.load %arg0[%c0, %c0_3] : memref<32x8xf32, #tpu.memory_space<vmem>>, vector<32x8xf32>
    %c0_4 = arith.constant 0 : index
    %c0_5 = arith.constant 0 : index
    %18 = vector.load %arg1[%c0_4, %c0_5] : memref<8x12xf32, #tpu.memory_space<vmem>>, vector<8x12xf32>
    %c0_6 = arith.constant 0 : index
    %c0_7 = arith.constant 0 : index
    %19 = vector.load %arg2[%c0_6, %c0_7] : memref<8x12xf32, #tpu.memory_space<vmem>>, vector<8x12xf32>
    %c0_8 = arith.constant 0 : index
    %c0_9 = arith.constant 0 : index
    %20 = vector.load %arg3[%c0_8, %c0_9] : memref<1x12xf32, #tpu.memory_space<vmem>>, vector<1x12xf32>
    %c0_10 = arith.constant 0 : index
    %c0_11 = arith.constant 0 : index
    %21 = vector.load %arg4[%c0_10, %c0_11] : memref<12x12xf32, #tpu.memory_space<vmem>>, vector<12x12xf32>
    %c0_12 = arith.constant 0 : index
    %c0_13 = arith.constant 0 : index
    %22 = vector.load %arg5[%c0_12, %c0_13] : memref<12x12xf32, #tpu.memory_space<vmem>>, vector<12x12xf32>
    %c0_14 = arith.constant 0 : index
    %c0_15 = arith.constant 0 : index
    %23 = vector.load %arg6[%c0_14, %c0_15] : memref<1x12xf32, #tpu.memory_space<vmem>>, vector<1x12xf32>
    %c1_i32_16 = arith.constant 1 : i32
    %24 = vector.broadcast %c1_i32_16 : i32 to vector<32x1xi32>
    %25 = arith.cmpi sge, %16, %24 : vector<32x1xi32>
    %26 = arith.extui %25 : vector<32x1xi1> to vector<32x1xi32>
    %27 = arith.sitofp %26 : vector<32x1xi32> to vector<32x1xf32>
    %cst = arith.constant dense<0.000000e+00> : vector<32x12xf32>
    %28 = tpu.matmul %17, %18, %cst {dimension_numbers = #tpu.dot_dimension_numbers<[1], [0], [0], [1], [0, 0, 1, 1], [], []>} : vector<32x8xf32>, vector<8x12xf32>, vector<32x12xf32> -> vector<32x12xf32>
    %cst_17 = arith.constant 0.000000e+00 : f32
    %29 = vector.broadcast %cst_17 : f32 to vector<1x8xf32>
    %30 = vector.extract_strided_slice %17 {offsets = [0, 0], sizes = [31, 8], strides = [1, 1]} : vector<32x8xf32> to vector<31x8xf32>
    %31 = tpu.concatenate %29, %30 in 0 : vector<1x8xf32>, vector<31x8xf32> -> vector<32x8xf32>
    %32 = vector.broadcast %27 : vector<32x1xf32> to vector<32x8xf32>
    %33 = arith.mulf %31, %32 : vector<32x8xf32>
    %cst_18 = arith.constant dense<0.000000e+00> : vector<32x12xf32>
    %34 = tpu.matmul %33, %19, %cst_18 {dimension_numbers = #tpu.dot_dimension_numbers<[1], [0], [0], [1], [0, 0, 1, 1], [], []>} : vector<32x8xf32>, vector<8x12xf32>, vector<32x12xf32> -> vector<32x12xf32>
    %35 = arith.addf %28, %34 : vector<32x12xf32>
    %36 = vector.broadcast %20 : vector<1x12xf32> to vector<32x12xf32>
    %37 = arith.addf %35, %36 : vector<32x12xf32>
    %cst_19 = arith.constant 0.000000e+00 : f32
    %38 = vector.broadcast %cst_19 : f32 to vector<32x12xf32>
    %39 = arith.maximumf %37, %38 : vector<32x12xf32>
    %cst_20 = arith.constant dense<0.000000e+00> : vector<32x12xf32>
    %40 = tpu.matmul %39, %21, %cst_20 {dimension_numbers = #tpu.dot_dimension_numbers<[1], [0], [0], [1], [0, 0, 1, 1], [], []>} : vector<32x12xf32>, vector<12x12xf32>, vector<32x12xf32> -> vector<32x12xf32>
    %cst_21 = arith.constant 0.000000e+00 : f32
    %41 = vector.broadcast %cst_21 : f32 to vector<1x12xf32>
    %42 = vector.extract_strided_slice %39 {offsets = [0, 0], sizes = [31, 12], strides = [1, 1]} : vector<32x12xf32> to vector<31x12xf32>
    %43 = tpu.concatenate %41, %42 in 0 : vector<1x12xf32>, vector<31x12xf32> -> vector<32x12xf32>
    %44 = vector.broadcast %27 : vector<32x1xf32> to vector<32x12xf32>
    %45 = arith.mulf %43, %44 : vector<32x12xf32>
    %cst_22 = arith.constant dense<0.000000e+00> : vector<32x12xf32>
    %46 = tpu.matmul %45, %22, %cst_22 {dimension_numbers = #tpu.dot_dimension_numbers<[1], [0], [0], [1], [0, 0, 1, 1], [], []>} : vector<32x12xf32>, vector<12x12xf32>, vector<32x12xf32> -> vector<32x12xf32>
    %47 = arith.addf %40, %46 : vector<32x12xf32>
    %48 = vector.broadcast %23 : vector<1x12xf32> to vector<32x12xf32>
    %49 = arith.addf %47, %48 : vector<32x12xf32>
    %cst_23 = arith.constant 0.000000e+00 : f32
    %50 = vector.broadcast %cst_23 : f32 to vector<32x12xf32>
    %51 = arith.maximumf %49, %50 : vector<32x12xf32>
    %c0_24 = arith.constant 0 : index
    %c0_25 = arith.constant 0 : index
    %52 = vector.load %arg7[%c0_24, %c0_25] : memref<8x12xf32, #tpu.memory_space<vmem>>, vector<8x12xf32>
    %c0_26 = arith.constant 0 : index
    %c0_27 = arith.constant 0 : index
    %53 = vector.load %arg8[%c0_26, %c0_27] : memref<1x12xf32, #tpu.memory_space<vmem>>, vector<1x12xf32>
    %cst_28 = arith.constant dense<0.000000e+00> : vector<32x12xf32>
    %54 = tpu.matmul %17, %52, %cst_28 {dimension_numbers = #tpu.dot_dimension_numbers<[1], [0], [0], [1], [0, 0, 1, 1], [], []>} : vector<32x8xf32>, vector<8x12xf32>, vector<32x12xf32> -> vector<32x12xf32>
    %55 = vector.broadcast %53 : vector<1x12xf32> to vector<32x12xf32>
    %56 = arith.addf %54, %55 : vector<32x12xf32>
    %57 = arith.addf %51, %56 : vector<32x12xf32>
    %cst_29 = arith.constant 0.000000e+00 : f32
    %58 = vector.broadcast %cst_29 : f32 to vector<32x12xf32>
    %59 = arith.maximumf %57, %58 : vector<32x12xf32>
    %c0_30 = arith.constant 0 : index
    %c0_31 = arith.constant 0 : index
    %60 = vector.load %arg9[%c0_30, %c0_31] : memref<12x12xf32, #tpu.memory_space<vmem>>, vector<12x12xf32>
    %c0_32 = arith.constant 0 : index
    %c0_33 = arith.constant 0 : index
    %61 = vector.load %arg10[%c0_32, %c0_33] : memref<12x12xf32, #tpu.memory_space<vmem>>, vector<12x12xf32>
    %c0_34 = arith.constant 0 : index
    %c0_35 = arith.constant 0 : index
    %62 = vector.load %arg11[%c0_34, %c0_35] : memref<1x12xf32, #tpu.memory_space<vmem>>, vector<1x12xf32>
    %c0_36 = arith.constant 0 : index
    %c0_37 = arith.constant 0 : index
    %63 = vector.load %arg12[%c0_36, %c0_37] : memref<12x12xf32, #tpu.memory_space<vmem>>, vector<12x12xf32>
    %c0_38 = arith.constant 0 : index
    %c0_39 = arith.constant 0 : index
    %64 = vector.load %arg13[%c0_38, %c0_39] : memref<12x12xf32, #tpu.memory_space<vmem>>, vector<12x12xf32>
    %c0_40 = arith.constant 0 : index
    %c0_41 = arith.constant 0 : index
    %65 = vector.load %arg14[%c0_40, %c0_41] : memref<1x12xf32, #tpu.memory_space<vmem>>, vector<1x12xf32>
    %c2_i32 = arith.constant 2 : i32
    %66 = vector.broadcast %c2_i32 : i32 to vector<32x1xi32>
    %67 = arith.cmpi sge, %16, %66 : vector<32x1xi32>
    %68 = arith.extui %67 : vector<32x1xi1> to vector<32x1xi32>
    %69 = arith.sitofp %68 : vector<32x1xi32> to vector<32x1xf32>
    %cst_42 = arith.constant dense<0.000000e+00> : vector<32x12xf32>
    %70 = tpu.matmul %59, %60, %cst_42 {dimension_numbers = #tpu.dot_dimension_numbers<[1], [0], [0], [1], [0, 0, 1, 1], [], []>} : vector<32x12xf32>, vector<12x12xf32>, vector<32x12xf32> -> vector<32x12xf32>
    %cst_43 = arith.constant 0.000000e+00 : f32
    %71 = vector.broadcast %cst_43 : f32 to vector<2x12xf32>
    %72 = vector.extract_strided_slice %59 {offsets = [0, 0], sizes = [30, 12], strides = [1, 1]} : vector<32x12xf32> to vector<30x12xf32>
    %73 = tpu.concatenate %71, %72 in 0 : vector<2x12xf32>, vector<30x12xf32> -> vector<32x12xf32>
    %74 = vector.broadcast %69 : vector<32x1xf32> to vector<32x12xf32>
    %75 = arith.mulf %73, %74 : vector<32x12xf32>
    %cst_44 = arith.constant dense<0.000000e+00> : vector<32x12xf32>
    %76 = tpu.matmul %75, %61, %cst_44 {dimension_numbers = #tpu.dot_dimension_numbers<[1], [0], [0], [1], [0, 0, 1, 1], [], []>} : vector<32x12xf32>, vector<12x12xf32>, vector<32x12xf32> -> vector<32x12xf32>
    %77 = arith.addf %70, %76 : vector<32x12xf32>
    %78 = vector.broadcast %62 : vector<1x12xf32> to vector<32x12xf32>
    %79 = arith.addf %77, %78 : vector<32x12xf32>
    %cst_45 = arith.constant 0.000000e+00 : f32
    %80 = vector.broadcast %cst_45 : f32 to vector<32x12xf32>
    %81 = arith.maximumf %79, %80 : vector<32x12xf32>
    %cst_46 = arith.constant dense<0.000000e+00> : vector<32x12xf32>
    %82 = tpu.matmul %81, %63, %cst_46 {dimension_numbers = #tpu.dot_dimension_numbers<[1], [0], [0], [1], [0, 0, 1, 1], [], []>} : vector<32x12xf32>, vector<12x12xf32>, vector<32x12xf32> -> vector<32x12xf32>
    %cst_47 = arith.constant 0.000000e+00 : f32
    %83 = vector.broadcast %cst_47 : f32 to vector<2x12xf32>
    %84 = vector.extract_strided_slice %81 {offsets = [0, 0], sizes = [30, 12], strides = [1, 1]} : vector<32x12xf32> to vector<30x12xf32>
    %85 = tpu.concatenate %83, %84 in 0 : vector<2x12xf32>, vector<30x12xf32> -> vector<32x12xf32>
    %86 = vector.broadcast %69 : vector<32x1xf32> to vector<32x12xf32>
    %87 = arith.mulf %85, %86 : vector<32x12xf32>
    %cst_48 = arith.constant dense<0.000000e+00> : vector<32x12xf32>
    %88 = tpu.matmul %87, %64, %cst_48 {dimension_numbers = #tpu.dot_dimension_numbers<[1], [0], [0], [1], [0, 0, 1, 1], [], []>} : vector<32x12xf32>, vector<12x12xf32>, vector<32x12xf32> -> vector<32x12xf32>
    %89 = arith.addf %82, %88 : vector<32x12xf32>
    %90 = vector.broadcast %65 : vector<1x12xf32> to vector<32x12xf32>
    %91 = arith.addf %89, %90 : vector<32x12xf32>
    %cst_49 = arith.constant 0.000000e+00 : f32
    %92 = vector.broadcast %cst_49 : f32 to vector<32x12xf32>
    %93 = arith.maximumf %91, %92 : vector<32x12xf32>
    %94 = arith.addf %93, %59 : vector<32x12xf32>
    %cst_50 = arith.constant 0.000000e+00 : f32
    %95 = vector.broadcast %cst_50 : f32 to vector<32x12xf32>
    %96 = arith.maximumf %94, %95 : vector<32x12xf32>
    %c0_51 = arith.constant 0 : index
    %c0_52 = arith.constant 0 : index
    %97 = vector.load %arg15[%c0_51, %c0_52] : memref<12x12xf32, #tpu.memory_space<vmem>>, vector<12x12xf32>
    %c0_53 = arith.constant 0 : index
    %c0_54 = arith.constant 0 : index
    %98 = vector.load %arg16[%c0_53, %c0_54] : memref<12x12xf32, #tpu.memory_space<vmem>>, vector<12x12xf32>
    %c0_55 = arith.constant 0 : index
    %c0_56 = arith.constant 0 : index
    %99 = vector.load %arg17[%c0_55, %c0_56] : memref<1x12xf32, #tpu.memory_space<vmem>>, vector<1x12xf32>
    %c0_57 = arith.constant 0 : index
    %c0_58 = arith.constant 0 : index
    %100 = vector.load %arg18[%c0_57, %c0_58] : memref<12x12xf32, #tpu.memory_space<vmem>>, vector<12x12xf32>
    %c0_59 = arith.constant 0 : index
    %c0_60 = arith.constant 0 : index
    %101 = vector.load %arg19[%c0_59, %c0_60] : memref<12x12xf32, #tpu.memory_space<vmem>>, vector<12x12xf32>
    %c0_61 = arith.constant 0 : index
    %c0_62 = arith.constant 0 : index
    %102 = vector.load %arg20[%c0_61, %c0_62] : memref<1x12xf32, #tpu.memory_space<vmem>>, vector<1x12xf32>
    %c4_i32 = arith.constant 4 : i32
    %103 = vector.broadcast %c4_i32 : i32 to vector<32x1xi32>
    %104 = arith.cmpi sge, %16, %103 : vector<32x1xi32>
    %105 = arith.extui %104 : vector<32x1xi1> to vector<32x1xi32>
    %106 = arith.sitofp %105 : vector<32x1xi32> to vector<32x1xf32>
    %cst_63 = arith.constant dense<0.000000e+00> : vector<32x12xf32>
    %107 = tpu.matmul %96, %97, %cst_63 {dimension_numbers = #tpu.dot_dimension_numbers<[1], [0], [0], [1], [0, 0, 1, 1], [], []>} : vector<32x12xf32>, vector<12x12xf32>, vector<32x12xf32> -> vector<32x12xf32>
    %cst_64 = arith.constant 0.000000e+00 : f32
    %108 = vector.broadcast %cst_64 : f32 to vector<4x12xf32>
    %109 = vector.extract_strided_slice %96 {offsets = [0, 0], sizes = [28, 12], strides = [1, 1]} : vector<32x12xf32> to vector<28x12xf32>
    %110 = tpu.concatenate %108, %109 in 0 : vector<4x12xf32>, vector<28x12xf32> -> vector<32x12xf32>
    %111 = vector.broadcast %106 : vector<32x1xf32> to vector<32x12xf32>
    %112 = arith.mulf %110, %111 : vector<32x12xf32>
    %cst_65 = arith.constant dense<0.000000e+00> : vector<32x12xf32>
    %113 = tpu.matmul %112, %98, %cst_65 {dimension_numbers = #tpu.dot_dimension_numbers<[1], [0], [0], [1], [0, 0, 1, 1], [], []>} : vector<32x12xf32>, vector<12x12xf32>, vector<32x12xf32> -> vector<32x12xf32>
    %114 = arith.addf %107, %113 : vector<32x12xf32>
    %115 = vector.broadcast %99 : vector<1x12xf32> to vector<32x12xf32>
    %116 = arith.addf %114, %115 : vector<32x12xf32>
    %cst_66 = arith.constant 0.000000e+00 : f32
    %117 = vector.broadcast %cst_66 : f32 to vector<32x12xf32>
    %118 = arith.maximumf %116, %117 : vector<32x12xf32>
    %cst_67 = arith.constant dense<0.000000e+00> : vector<32x12xf32>
    %119 = tpu.matmul %118, %100, %cst_67 {dimension_numbers = #tpu.dot_dimension_numbers<[1], [0], [0], [1], [0, 0, 1, 1], [], []>} : vector<32x12xf32>, vector<12x12xf32>, vector<32x12xf32> -> vector<32x12xf32>
    %cst_68 = arith.constant 0.000000e+00 : f32
    %120 = vector.broadcast %cst_68 : f32 to vector<4x12xf32>
    %121 = vector.extract_strided_slice %118 {offsets = [0, 0], sizes = [28, 12], strides = [1, 1]} : vector<32x12xf32> to vector<28x12xf32>
    %122 = tpu.concatenate %120, %121 in 0 : vector<4x12xf32>, vector<28x12xf32> -> vector<32x12xf32>
    %123 = vector.broadcast %106 : vector<32x1xf32> to vector<32x12xf32>
    %124 = arith.mulf %122, %123 : vector<32x12xf32>
    %cst_69 = arith.constant dense<0.000000e+00> : vector<32x12xf32>
    %125 = tpu.matmul %124, %101, %cst_69 {dimension_numbers = #tpu.dot_dimension_numbers<[1], [0], [0], [1], [0, 0, 1, 1], [], []>} : vector<32x12xf32>, vector<12x12xf32>, vector<32x12xf32> -> vector<32x12xf32>
    %126 = arith.addf %119, %125 : vector<32x12xf32>
    %127 = vector.broadcast %102 : vector<1x12xf32> to vector<32x12xf32>
    %128 = arith.addf %126, %127 : vector<32x12xf32>
    %cst_70 = arith.constant 0.000000e+00 : f32
    %129 = vector.broadcast %cst_70 : f32 to vector<32x12xf32>
    %130 = arith.maximumf %128, %129 : vector<32x12xf32>
    %131 = arith.addf %130, %96 : vector<32x12xf32>
    %cst_71 = arith.constant 0.000000e+00 : f32
    %132 = vector.broadcast %cst_71 : f32 to vector<32x12xf32>
    %133 = arith.maximumf %131, %132 : vector<32x12xf32>
    %c0_72 = arith.constant 0 : index
    %c0_73 = arith.constant 0 : index
    %134 = vector.load %arg21[%c0_72, %c0_73] : memref<12x1xf32, #tpu.memory_space<vmem>>, vector<12x1xf32>
    %c0_74 = arith.constant 0 : index
    %c0_75 = arith.constant 0 : index
    %135 = vector.load %arg22[%c0_74, %c0_75] : memref<1x1xf32, #tpu.memory_space<vmem>>, vector<1x1xf32>
    %cst_76 = arith.constant dense<0.000000e+00> : vector<32x1xf32>
    %136 = tpu.matmul %133, %134, %cst_76 {dimension_numbers = #tpu.dot_dimension_numbers<[1], [0], [0], [1], [0, 0, 1, 1], [], []>} : vector<32x12xf32>, vector<12x1xf32>, vector<32x1xf32> -> vector<32x1xf32>
    %137 = vector.broadcast %135 : vector<1x1xf32> to vector<32x1xf32>
    %138 = arith.addf %136, %137 : vector<32x1xf32>
    %c0_77 = arith.constant 0 : index
    %c0_78 = arith.constant 0 : index
    %139 = vector.load %arg23[%c0_77, %c0_78] : memref<32x1xf32, #tpu.memory_space<vmem>>, vector<32x1xf32>
    tpu.vector_store %arg23[%c0_77, %c0_78], %138 {strides = array<i32>} : memref<32x1xf32, #tpu.memory_space<vmem>>, vector<32x1xf32>,
    return
  }
}

</mosaic_0001>

<bundles_post_ra>
// kernel: discriminator_forward.1
= control target key start
LH: loop header
LB: loop body
LE: loop exit
PB: predicated region body
PF: predicated region fallthrough
CT: control target
= control target key end

     0   :  { %s3055_s0 = inlined_call_operand.vmem [shape: f32[32,8], index: 0, kind: input, shape index: {}]   ;;  %s3056_s1 = inlined_call_operand.hbm [shape: f32[8,12], index: 1, kind: input, shape index: {}]   ;;  %s3057_s2 = inlined_call_operand.hbm [shape: f32[8,12], index: 2, kind: input, shape index: {}]   ;;  %s3058_s3 = inlined_call_operand.vmem [shape: f32[1,12], index: 3, kind: input, shape index: {}]   ;;  %s3059_s4 = inlined_call_operand.vmem [shape: f32[12,12], index: 4, kind: input, shape index: {}]   ;;  %s3060_s5 = inlined_call_operand.vmem [shape: f32[12,12], index: 5, kind: input, shape index: {}]   ;;  %s3061_s6 = inlined_call_operand.vmem [shape: f32[1,12], index: 6, kind: input, shape index: {}]   ;;  %s3062_s7 = inlined_call_operand.hbm [shape: f32[8,12], index: 7, kind: input, shape index: {}]   ;;  %s3063_s8 = inlined_call_operand.vmem [shape: f32[1,12], index: 8, kind: input, shape index: {}]   ;;  %s3064_s9 = inlined_call_operand.vmem [shape: f32[12,12], index: 9, kind: input, shape index: {}]   ;;  %s3065_s10 = inlined_call_operand.vmem [shape: f32[12,12], index: 10, kind: input, shape index: {}]   ;;  %s3066_s11 = inlined_call_operand.hbm [shape: f32[1,12], index: 11, kind: input, shape index: {}]   ;;  %s3067_s12 = inlined_call_operand.vmem [shape: f32[12,12], index: 12, kind: input, shape index: {}]   ;;  %s3068_s13 = inlined_call_operand.vmem [shape: f32[12,12], index: 13, kind: input, shape index: {}]   ;;  %s3069_s14 = inlined_call_operand.hbm [shape: f32[1,12], index: 14, kind: input, shape index: {}]   ;;  %s3070_s15 = inlined_call_operand.vmem [shape: f32[12,12], index: 15, kind: input, shape index: {}]   ;;  %s3071_s16 = inlined_call_operand.hbm [shape: f32[12,12], index: 16, kind: input, shape index: {}]   ;;  %s3072_s17 = inlined_call_operand.hbm [shape: f32[1,12], index: 17, kind: input, shape index: {}]   ;;  %s3073_s18 = inlined_call_operand.hbm [shape: f32[12,12], index: 18, kind: input, shape index: {}]   ;;  %s3074_s19 = inlined_call_operand.vmem [shape: f32[12,12], index: 19, kind: input, shape index: {}]   ;;  %s3075_s20 = inlined_call_operand.hbm [shape: f32[1,12], index: 20, kind: input, shape index: {}]   ;;  %s3076_s21 = inlined_call_operand.vmem [shape: f32[12,1], index: 21, kind: input, shape index: {}]   ;;  %s3077_s22 = inlined_call_operand.<no memory space> [shape: f32[1,1], index: 22, kind: input, shape index: {}]   ;;  %s3078_s23 = inlined_call_operand.vmem [shape: f32[32,1], index: 23, kind: output, shape index: {}]  }
   0x1   :  { %3085 = sst [smem:[#allocation22_spill]] %s3055_s0  ;;  %v28_v0 = vstv %s3077_s22 }
   0x2   :  { %3086 = sst [smem:[#allocation23_spill]] %s3056_s1  ;;  %29 = vst [vmem:[#allocation2] sm:$0x1] %v28_v0 }
   0x3   :  { %3087 = sst [smem:[#allocation24_spill]] %s3057_s2 }
   0x4   :  { %3088 = sst [smem:[#allocation25_spill]] %s3058_s3 }
   0x5   :  { %3089 = sst [smem:[#allocation26_spill]] %s3059_s4 }
   0x6   :  { %3090 = sst [smem:[#allocation27_spill]] %s3060_s5 }
   0x7   :  { %3091 = sst [smem:[#allocation28_spill]] %s3061_s6 }
   0x8   :  { %3092 = sst [smem:[#allocation29_spill]] %s3062_s7 }
   0x9   :  { %30 = vsyncpa [#allocation4], 0 }
   0xa   :  { %31 = vsyncpa [#allocation6], 0 }
   0xb   :  { %32 = vsyncpa [#allocation9], 0 }
   0xc   :  { %33 = vsyncpa [#allocation12], 0 }
   0xd   :  { %34 = vsyncpa [#allocation15], 0  ;;  %s2531_s24 = smov [#allocation5]   ;;  %s2532_s5 = smov [#allocation8]  }
   0xe   :  { %s53_s25 = sshll.u32 %s2531_s24, 4  ;;  %s87_s1 = sshll.u32 %s2532_s5, 4  ;;  %s54_s25 = int_to_ptr.vmem [resolvable:$true] %s53_s25  ;;  %s88_s1 = int_to_ptr.vmem [resolvable:$true] %s87_s1 }
   0xf   :  { %s3093_s6 = sld [smem:[#allocation24_spill]] }
  0x15   :  { %s2323_s27 = scalar_lea.hbm %s3093_s6, 128 }
  0x16   :  { %p2324_p0 = scmp.ne.s32.totalorder %s3093_s6, %s2323_s27  ;;  %p2327_p1 = scmp.lt.u32.totalorder %s2323_s27, %s3093_s6 }
  0x18   :  { %p2329_p2 = pnand %p2327_p1, %p2324_p0 }
  0x1a   :  { %2332 = shalt.err (!%p2329_p2)
}
  0x1b   :  { %s2333_s3 = scalar_lea.vmem %s54_s25, 128  ;;  %p2338_p4 = scmp.lt.s32.totalorder %s54_s25, %s54_s25 }
  0x1c   :  { %p2334_p3 = scmp.ne.s32.totalorder %s54_s25, %s2333_s3  ;;  %p2339_p5 = scmp.lt.s32.totalorder %s2333_s3, %s2333_s3 }
  0x1e   :  { %p2340_p6 = por %p2339_p5, %p2338_p4 }
  0x20   :  { %p2341_p7 = pnand %p2340_p6, %p2334_p3 }
  0x22   :  { %2344 = shalt.err (!%p2341_p7)
}
  0x23   :  { %56 = dma.hbm_to_vmem [thread:$0]  %s3093_s6, 128, %s54_s25, [#allocation6]  }
  0x24   :  { %s2345_s5 = scalar_lea.hbm %s3066_s11, 16 }
  0x25   :  { %p2346_p8 = scmp.ne.s32.totalorder %s3066_s11, %s2345_s5  ;;  %p2349_p9 = scmp.lt.u32.totalorder %s2345_s5, %s3066_s11 }
  0x27   :  { %p2351_p10 = pnand %p2349_p9, %p2346_p8 }
  0x29   :  { %2354 = shalt.err (!%p2351_p10)
}
  0x2a   :  { %s2355_s28 = scalar_lea.vmem %s88_s1, 16  ;;  %s2359_s22 = scalar_lea.vmem %s88_s1, 32 }
  0x2b   :  { %p2356_p11 = scmp.ne.s32.totalorder %s88_s1, %s2355_s28  ;;  %p2360_p12 = scmp.lt.s32.totalorder %s88_s1, %s88_s1 }
  0x2c   :  { %p2361_p13 = scmp.lt.s32.totalorder %s2359_s22, %s2355_s28 }
  0x2e   :  { %p2362_p0 = por %p2361_p13, %p2360_p12 }
  0x30   :  { %p2363_p1 = pnand %p2362_p0, %p2356_p11 }
  0x32   :  { %2366 = shalt.err (!%p2363_p1)
}
  0x33   :  { %90 = dma.hbm_to_vmem [thread:$0]  %s3066_s11, 16, %s88_s1, [#allocation9]  }
  0x34   :  { %s2533_s29 = smov [#allocation11]   ;;  %s2367_s30 = scalar_lea.hbm %s3071_s16, 256 }
  0x35   :  { %s112_s3 = sshll.u32 %s2533_s29, 4  ;;  %p2368_p2 = scmp.ne.s32.totalorder %s3071_s16, %s2367_s30  ;;  %s113_s3 = int_to_ptr.vmem [resolvable:$true] %s112_s3 }
  0x36   :  { %p2371_p3 = scmp.lt.u32.totalorder %s2367_s30, %s3071_s16 }
  0x38   :  { %p2373_p4 = pnand %p2371_p3, %p2368_p2 }
  0x3a   :  { %2376 = shalt.err (!%p2373_p4)
}
  0x3b   :  { %s2377_s27 = scalar_lea.vmem %s113_s3, 256  ;;  %p2382_p6 = scmp.lt.s32.totalorder %s113_s3, %s113_s3 }
  0x3c   :  { %p2378_p5 = scmp.ne.s32.totalorder %s113_s3, %s2377_s27  ;;  %p2383_p7 = scmp.lt.s32.totalorder %s2377_s27, %s2377_s27 }
  0x3e   :  { %p2384_p8 = por %p2383_p7, %p2382_p6 }
  0x40   :  { %p2385_p9 = pnand %p2384_p8, %p2378_p5 }
  0x42   :  { %2388 = shalt.err (!%p2385_p9)
}
  0x43   :  { %s2534_s11 = smov 128   ;;  %s2535_s1 = smov 8  }
  0x44   :  { %118 = dma.hbm_to_vmem [thread:$0]  %s3071_s16, 256, %s113_s3, [#allocation12], %s2534_s11, %s2534_s11, %s2535_s1  }
  0x45   :  { %s2536_s22 = smov [#allocation14]   ;;  %s2537_s6 = smov [#allocation3]  }
  0x46   :  { %s134_s25 = sshll.u32 %s2536_s22, 4  ;;  %s43_s29 = sshll.u32 %s2537_s6, 4  ;;  %s135_s25 = int_to_ptr.vmem [resolvable:$true] %s134_s25  ;;  %s44_s29 = int_to_ptr.vmem [resolvable:$true] %s43_s29 }
  0x47   :  { %s2389_s30 = scalar_lea.hbm %s3073_s18, 256 }
  0x48   :  { %p2390_p10 = scmp.ne.s32.totalorder %s3073_s18, %s2389_s30  ;;  %p2393_p11 = scmp.lt.u32.totalorder %s2389_s30, %s3073_s18 }
  0x4a   :  { %p2395_p12 = pnand %p2393_p11, %p2390_p10 }
  0x4c   :  { %2398 = shalt.err (!%p2395_p12)
}
  0x4d   :  { %s2399_s16 = scalar_lea.vmem %s135_s25, 256  ;;  %p2404_p0 = scmp.lt.s32.totalorder %s135_s25, %s135_s25 }
  0x4e   :  { %p2400_p13 = scmp.ne.s32.totalorder %s135_s25, %s2399_s16  ;;  %p2405_p1 = scmp.lt.s32.totalorder %s2399_s16, %s2399_s16 }
  0x50   :  { %p2406_p2 = por %p2405_p1, %p2404_p0 }
  0x52   :  { %p2407_p3 = pnand %p2406_p2, %p2400_p13 }
  0x54   :  { %2410 = shalt.err (!%p2407_p3)
}
  0x55   :  { %140 = dma.hbm_to_vmem [thread:$0]  %s3073_s18, 256, %s135_s25, [#allocation15], %s2534_s11, %s2534_s11, %s2535_s1  }
  0x56   :  { %s3094_s22 = sld [smem:[#allocation23_spill]] }
  0x5c   :  { %s2411_s6 = scalar_lea.hbm %s3094_s22, 128 }
  0x5d   :  { %p2412_p4 = scmp.ne.s32.totalorder %s3094_s22, %s2411_s6  ;;  %p2415_p5 = scmp.lt.u32.totalorder %s2411_s6, %s3094_s22 }
  0x5f   :  { %p2417_p6 = pnand %p2415_p5, %p2412_p4 }
  0x61   :  { %2420 = shalt.err (!%p2417_p6)
}
  0x62   :  { %s2421_s5 = scalar_lea.vmem %s44_s29, 128  ;;  %p2426_p8 = scmp.lt.s32.totalorder %s44_s29, %s44_s29 }
  0x63   :  { %p2422_p7 = scmp.ne.s32.totalorder %s44_s29, %s2421_s5  ;;  %p2427_p9 = scmp.lt.s32.totalorder %s2421_s5, %s2421_s5 }
  0x65   :  { %p2428_p10 = por %p2427_p9, %p2426_p8 }
  0x67   :  { %p2429_p11 = pnand %p2428_p10, %p2422_p7 }
  0x69   :  { %2432 = shalt.err (!%p2429_p11)
}
  0x6a   :  { %46 = dma.hbm_to_vmem [thread:$0]  %s3094_s22, 128, %s44_s29, [#allocation4]  }
  0x6b   :  { %s2538_s1 = smov [#allocation7]   ;;  %s2539_s26 = smov [#allocation10]  }
  0x6c   :  { %s71_s25 = sshll.u32 %s2538_s1, 4  ;;  %s101_s2 = sshll.u32 %s2539_s26, 4  ;;  %s72_s25 = int_to_ptr.vmem [resolvable:$true] %s71_s25  ;;  %s102_s2 = int_to_ptr.vmem [resolvable:$true] %s101_s2 }
  0x6d   :  { %s3095_s27 = sld [smem:[#allocation29_spill]] }
  0x73   :  { %s2433_s7 = scalar_lea.hbm %s3095_s27, 128 }
  0x74   :  { %p2434_p12 = scmp.ne.s32.totalorder %s3095_s27, %s2433_s7  ;;  %p2437_p13 = scmp.lt.u32.totalorder %s2433_s7, %s3095_s27 }
  0x76   :  { %p2439_p0 = pnand %p2437_p13, %p2434_p12 }
  0x78   :  { %2442 = shalt.err (!%p2439_p0)
}
  0x79   :  { %s2443_s29 = scalar_lea.vmem %s72_s25, 128  ;;  %p2448_p2 = scmp.lt.s32.totalorder %s72_s25, %s72_s25 }
  0x7a   :  { %p2444_p1 = scmp.ne.s32.totalorder %s72_s25, %s2443_s29  ;;  %p2449_p3 = scmp.lt.s32.totalorder %s2443_s29, %s2443_s29 }
  0x7c   :  { %p2450_p4 = por %p2449_p3, %p2448_p2 }
  0x7e   :  { %p2451_p5 = pnand %p2450_p4, %p2444_p1 }
  0x80   :  { %2454 = shalt.err (!%p2451_p5)
}
  0x81   :  { %74 = dma.hbm_to_vmem [thread:$0]  %s3095_s27, 128, %s72_s25, [#allocation6]  }
  0x82   :  { %s2455_s18 = scalar_lea.hbm %s3069_s14, 16 }
  0x83   :  { %p2456_p6 = scmp.ne.s32.totalorder %s3069_s14, %s2455_s18  ;;  %p2459_p7 = scmp.lt.u32.totalorder %s2455_s18, %s3069_s14 }
  0x85   :  { %p2461_p8 = pnand %p2459_p7, %p2456_p6 }
  0x87   :  { %2464 = shalt.err (!%p2461_p8)
}
  0x88   :  { %s2465_s3 = scalar_lea.vmem %s102_s2, 16  ;;  %s2469_s7 = scalar_lea.vmem %s102_s2, 32 }
  0x89   :  { %p2466_p9 = scmp.ne.s32.totalorder %s102_s2, %s2465_s3  ;;  %p2470_p10 = scmp.lt.s32.totalorder %s102_s2, %s102_s2 }
  0x8a   :  { %p2471_p11 = scmp.lt.s32.totalorder %s2469_s7, %s2465_s3 }
  0x8c   :  { %p2472_p12 = por %p2471_p11, %p2470_p10 }
  0x8e   :  { %p2473_p13 = pnand %p2472_p12, %p2466_p9 }
  0x90   :  { %2476 = shalt.err (!%p2473_p13)
}
  0x91   :  { %104 = dma.hbm_to_vmem [thread:$0]  %s3069_s14, 16, %s102_s2, [#allocation9]  }
  0x92   :  { %s2540_s28 = smov [#allocation13]   ;;  %s2541_s0 = smov [#allocation16]  }
  0x93   :  { %s125_s6 = sshll.u32 %s2540_s28, 4  ;;  %s149_s4 = sshll.u32 %s2541_s0, 4  ;;  %s126_s6 = int_to_ptr.vmem [resolvable:$true] %s125_s6  ;;  %s150_s4 = int_to_ptr.vmem [resolvable:$true] %s149_s4 }
  0x94   :  { %s2477_s30 = scalar_lea.hbm %s3072_s17, 16 }
  0x95   :  { %p2478_p0 = scmp.ne.s32.totalorder %s3072_s17, %s2477_s30  ;;  %p2481_p1 = scmp.lt.u32.totalorder %s2477_s30, %s3072_s17 }
  0x97   :  { %p2483_p2 = pnand %p2481_p1, %p2478_p0 }
  0x99   :  { %2486 = shalt.err (!%p2483_p2)
}
  0x9a   :  { %s2487_s14 = scalar_lea.vmem %s126_s6, 16  ;;  %s2491_s2 = scalar_lea.vmem %s126_s6, 32 }
  0x9b   :  { %p2488_p3 = scmp.ne.s32.totalorder %s126_s6, %s2487_s14  ;;  %p2492_p4 = scmp.lt.s32.totalorder %s126_s6, %s126_s6 }
  0x9c   :  { %p2493_p5 = scmp.lt.s32.totalorder %s2491_s2, %s2487_s14 }
  0x9e   :  { %p2494_p6 = por %p2493_p5, %p2492_p4 }
  0xa0   :  { %p2495_p7 = pnand %p2494_p6, %p2488_p3 }
  0xa2   :  { %2498 = shalt.err (!%p2495_p7)
}
  0xa3   :  { %128 = dma.hbm_to_vmem [thread:$0]  %s3072_s17, 16, %s126_s6, [#allocation12]  }
  0xa4   :  { %s2499_s7 = scalar_lea.hbm %s3075_s20, 16 }
  0xa5   :  { %p2500_p8 = scmp.ne.s32.totalorder %s3075_s20, %s2499_s7  ;;  %p2503_p9 = scmp.lt.u32.totalorder %s2499_s7, %s3075_s20 }
  0xa7   :  { %p2505_p10 = pnand %p2503_p9, %p2500_p8 }
  0xa9   :  { %2508 = shalt.err (!%p2505_p10)
}
  0xaa   :  { %s2509_s29 = scalar_lea.vmem %s150_s4, 16  ;;  %s2513_s22 = scalar_lea.vmem %s150_s4, 32 }
  0xab   :  { %p2510_p11 = scmp.ne.s32.totalorder %s150_s4, %s2509_s29  ;;  %p2514_p12 = scmp.lt.s32.totalorder %s150_s4, %s150_s4 }
  0xac   :  { %p2515_p13 = scmp.lt.s32.totalorder %s2513_s22, %s2509_s29 }
  0xae   :  { %p2516_p0 = por %p2515_p13, %p2514_p12 }
  0xb0   :  { %p2517_p1 = pnand %p2516_p0, %p2510_p11 }
  0xb2   :  { %2520 = shalt.err (!%p2517_p1)
}
  0xb3   :  { %152 = dma.hbm_to_vmem [thread:$0]  %s3075_s20, 16, %s150_s4, [#allocation15]  }
  0xb4   :  { %2521 = dma.done.wait [#allocation4], 128  }
  0xb5   :  { %2522 = vsyncadd [#allocation4], 4294967168 }
  0xb6   :  { %2523 = dma.done.wait [#allocation6], 256  }
  0xb7   :  { %2524 = vsyncadd [#allocation6], 4294967040 }
  0xb8   :  { %2525 = dma.done.wait [#allocation9], 32  }
  0xb9   :  { %2526 = vsyncadd [#allocation9], 4294967264 }
  0xba   :  { %2527 = dma.done.wait [#allocation12], 272  }
  0xbb   :  { %2528 = vsyncadd [#allocation12], 4294967024 }
  0xbc   :  { %2529 = dma.done.wait [#allocation15], 272  }
  0xbd   :  { %2530 = vsyncadd [#allocation15], 4294967024  ;;  %v184_v1 = vlaneseq  ;;  %v242_v6 = vld [vmem:[#allocation5] sm:$0xff]  ;;  %s3096_s30 = sld [smem:[#allocation22_spill]]  ;;  %vm265_vm1 = vcmask 1040384   ;;  %v241_v8 = vld [vmem:[#allocation3] sm:$0xff] }
  0xbe   :  { %2086 = vmatprep.subr.mxu0 %v242_v6  ;;  %v2542_v9 = vmov 0.0   ;;  %vm282_vm3 = vcmask 64512   ;;  %s3097_s16 = sld [smem:[#allocation27_spill]]  ;;  %vm520_vm4 = vcmask 1043456   ;;  %vm2543_vm5 = vmmov 1   ;;  %s3100_s28 = sld [smem:[#allocation26_spill]] }
  0xbf   :  { %v185_v2 = vshrl.u32 %v184_v1, 7  ;;  %2087 = vmatpush3.msra.mxu0 %v242_v6  ;;  %vm2821_vm6 = vmpackc.low %vm520_vm4, %vm2543_vm5  ;;  %v719_v32 = vld [vmem:[#allocation7] sm:$0xff]  ;;  %s3101_s6 = sld [smem:[#allocation25_spill]]  ;;  %vm507_vm7 = vcmask 97280   ;;  %v822_v60 = vld [vmem:[%s3065_s10] sm:$0xff]  ;;  %s3102_s1 = sld [smem:[#allocation28_spill]] }
  0xc0   :  { %2094 = vmatprep.subr.mxu0 %v241_v8  ;;  %v823_v61 = vld [vmem:[%s3065_s10 + $0x8] sm:$0xf]  ;;  %v820_v63 = vld [vmem:[%s3064_s9] sm:$0xff]  ;;  %vm846_vm9 = vcmask 1041408   ;;  %vm1910_vm13 = vcmask 7168  }
  0xc1   :  { %v187_v3 = vadd.s32 16, %v185_v2  ;;  %v2775_v4 = vand.u32 15, %v185_v2  ;;  %v2232_v62 = vpack.c.bf16 %v823_v61, %v822_v60  ;;  %v821_v0 = vld [vmem:[%s3064_s9 + $0x8] sm:$0xf] }
  0xc2   :  { %v2238_v1 = vpack.c.bf16 %v821_v0, %v820_v63 }
  0xc3   :  { %v2777_v5 = vand.u32 15, %v187_v3  ;;  %vm249_vm0 = vcmp.ge.s32.totalorder %v2775_v4, 1  ;;  %v237_v7 = vld [vmem:[%s3096_s30] sm:$0xff]  ;;  %v238_v12 = vld [vmem:[%s3096_s30 + $0x8] sm:$0xff]  ;;  %v239_v13 = vld [vmem:[%s3096_s30 + $0x10] sm:$0xff]  ;;  %vm830_vm8 = vcmp.ge.s32.totalorder %v2775_v4, 2 }
  0xc4   :  { %v2784_v10 = vsel %vm249_vm0, 1.0, %v2542_v9  ;;  %v266_v11 = vrot.slane %v237_v7, 7  ;;  %v240_v14 = vld [vmem:[%s3096_s30 + $0x18] sm:$0xff]  ;;  %v267_v15 = vrot.slane %v238_v12, 7  ;;  %v269_v17 = vrot.slane %v239_v13, 7  ;;  %v246_v25 = vld [vmem:[%s3097_s16] sm:$0xff] }
  0xc5   :  { %vm251_vm2 = vcmp.ge.s32.totalorder %v2777_v5, 1  ;;  %v271_v22 = vrot.slane %v240_v14, 7  ;;  %v247_v26 = vld [vmem:[%s3097_s16 + $0x8] sm:$0xf]  ;;  %v244_v29 = vld [vmem:[%s3100_s28] sm:$0xff]  ;;  %vm832_vm10 = vcmp.ge.s32.totalorder %v2777_v5, 2 }
  0xc6   :  { %v2797_v16 = vsel %vm251_vm2, 1.0, %v2542_v9  ;;  %v277_v18 = vsel %vm265_vm1, 0.0, %v266_v11  ;;  %v268_v20 = vsel %vm265_vm1, %v266_v11, %v267_v15  ;;  %v270_v21 = vsel %vm265_vm1, %v267_v15, %v269_v17  ;;  %v245_v30 = vld [vmem:[%s3100_s28 + $0x8] sm:$0xf]  ;;  %v1934_v33 = vld [vmem:[%s3101_s6] ss:$0 sm:$0xff] }
  0xc7   :  { %v278_v19 = vmul.f32 %v2784_v10, %v277_v18  ;;  %v280_v23 = vmul.f32 %v2797_v16, %v270_v21  ;;  %v272_v24 = vsel %vm265_vm1, %v269_v17, %v271_v22  ;;  %v2220_v27 = vpack.c.bf16 %v247_v26, %v246_v25  ;;  %v1945_v2 = vld [vmem:[%s3102_s1] ss:$0 sm:$0xff] }
  0xc8   :  { %v2226_v31 = vpack.c.bf16 %v245_v30, %v244_v29  ;;  %v1946_v3 = vld [vmem:[%s3063_s8] ss:$0 sm:$0xff]  ;;  %vm1321_vm11 = vcmp.ge.s32.totalorder %v2775_v4, 4  ;;  %vm1323_vm12 = vcmp.ge.s32.totalorder %v2777_v5, 4 }
  0xc9   :  { %2088 = vmatprep.mubr.msk.f32.mxu0 %vm282_vm3, %v278_v19  ;;  %2222 = vmatprep.subr.msk.bf16.mxu1 %vm2821_vm6, %v2220_v27 }
  0xca   :  { %2089 = vmatmul.mubr.msk.f32.vlgmr.msra.gmra.mrb[0].mxu0 %vm282_vm3, %v268_v20  ;;  %2225 = vmatpush3.bf16.msk.msra.mxu1 %vm2821_vm6, %v2220_v27 }
  0xcb   :  { %2095 = vmatpush3.msra.mxu0 %v241_v8  ;;  %2091 = vmatprep.mubr.msk.f32.mxu0 %vm282_vm3, %v280_v23 }
  0xcc   :  { %2122 = vmatprep.subr.mxu0 %v719_v32  ;;  %2228 = vmatprep.subr.msk.bf16.mxu1 %vm2821_vm6, %v2226_v31 }
  0xce   :  { %2092 = vmatmul.mubr.msk.f32.gmra.mrb[2].mxu0 %vm282_vm3, %v272_v24 }
  0xcf   :  { %2096 = vmatprep.mubr.msk.f32.mxu0 %vm282_vm3, %v237_v7 }
  0xd2   :  { %2097 = vmatmul.mubr.msk.f32.vlgmr.msra.gmra.mrb[0].mxu0 %vm282_vm3, %v238_v12 }
  0xd3   :  { %2099 = vmatprep.mubr.msk.f32.mxu0 %vm282_vm3, %v239_v13  ;;  %2123 = vmatpush3.msra.mxu0 %v719_v32 }
  0xd6   :  { %2100 = vmatmul.mubr.msk.f32.gmra.mrb[2].mxu0 %vm282_vm3, %v240_v14 }
  0xd7   :  { %2124 = vmatprep.mubr.msk.f32.mxu0 %vm282_vm3, %v237_v7 }
  0xda   :  { %2125 = vmatmul.mubr.msk.f32.vlgmr.msra.gmra.mrb[4].mxu0 %vm282_vm3, %v238_v12 }
  0xdb   :  { %2127 = vmatprep.mubr.msk.f32.mxu0 %vm282_vm3, %v239_v13 }
  0xde   :  { %2128 = vmatmul.mubr.msk.f32.gmra.mrb[6].mxu0 %vm282_vm3, %v240_v14 }
 0x1a5   :  { %v2098_v34 = vpop.f32.mrb[0].mxu0 }
 0x1a6   :  { %v480_v35 = vadd.f32 %v2098_v34, %v1934_v33  ;;  %v454_v36 = vpop.f32.mrb[1].mxu0 }
 0x1a7   :  { %v479_v37 = vadd.f32 %v1934_v33, %v454_v36 }
 0x1a8   :  { %v484_v38 = vmax.f32 %v480_v35, 0.0 }
 0x1a9   :  { %v483_v39 = vmax.f32 %v479_v37, 0.0  ;;  %v2101_v40 = vpop.f32.mrb[2].mxu0 }
 0x1aa   :  { %v492_v41 = vrot.slane %v484_v38, 7  ;;  %v482_v42 = vadd.f32 %v2101_v40, %v1934_v33  ;;  %v464_v43 = vpop.f32.mrb[3].mxu0 }
 0x1ab   :  { %v491_v44 = vrot.slane %v483_v39, 7  ;;  %v481_v45 = vadd.f32 %v1934_v33, %v464_v43 }
 0x1ac   :  { %v486_v46 = vmax.f32 %v482_v42, 0.0 }
 0x1ad   :  { %v485_v47 = vmax.f32 %v481_v45, 0.0  ;;  %v502_v48 = vsel %vm265_vm1, 0.0, %v491_v44  ;;  %v493_v49 = vsel %vm265_vm1, %v491_v44, %v492_v41  ;;  %v2126_v56 = vpop.f32.mrb[4].mxu0  ;;  %v827_v44 = vld [vmem:[%s3068_s13] sm:$0xff]  ;;  %v828_v45 = vld [vmem:[%s3068_s13 + $0x8] sm:$0xf] }
 0x1ae   :  { %v496_v50 = vrot.slane %v486_v46, 7  ;;  %v503_v51 = vmul.f32 %v2784_v10, %v502_v48  ;;  %v793_v57 = vpop.f32.mrb[5].mxu0  ;;  %v799_v10 = vadd.f32 %v2126_v56, %v1946_v3  ;;  %v826_v48 = vld [vmem:[%s3067_s12 + $0x8] sm:$0xf] }
 0x1af   :  { %v494_v52 = vrot.slane %v485_v47, 7  ;;  %v794_v12 = vadd.f32 %v1946_v3, %v793_v57 }
 0x1b0   :  { %2106 = vmatprep.mubr.msk.f32.mxu1 %vm507_vm7, %v503_v51 }
 0x1b1   :  { %v495_v53 = vsel %vm265_vm1, %v492_v41, %v494_v52  ;;  %2107 = vmatmul.mubr.msk.f32.vlgmr.msra.gmra.mrb[0].mxu1 %vm507_vm7, %v493_v49  ;;  %v497_v54 = vsel %vm265_vm1, %v494_v52, %v496_v50  ;;  %v2129_v58 = vpop.f32.mrb[6].mxu0  ;;  %v1963_v50 = vld [vmem:[#allocation8] ss:$0 sm:$0xff] }
 0x1b2   :  { %2231 = vmatpush3.bf16.msk.msra.mxu1 %vm2821_vm6, %v2226_v31  ;;  %v505_v55 = vmul.f32 %v2797_v16, %v495_v53  ;;  %v803_v59 = vpop.f32.mrb[7].mxu0  ;;  %v809_v19 = vadd.f32 %v2129_v58, %v1946_v3  ;;  %v1951_v31 = vsel %vm830_vm8, 1.0, %v2542_v9 }
 0x1b3   :  { %2234 = vmatprep.subr.msk.bf16.mxu1 %vm2821_vm6, %v2232_v62  ;;  %v804_v22 = vadd.f32 %v1946_v3, %v803_v59 }
 0x1b4   :  { %2109 = vmatprep.mubr.msk.f32.mxu1 %vm507_vm7, %v505_v55 }
 0x1b5   :  { %2110 = vmatmul.mubr.msk.f32.gmra.mrb[2].mxu1 %vm507_vm7, %v497_v54 }
 0x1b6   :  { %2116 = vmatprep.mubr.msk.f32.mxu1 %vm507_vm7, %v483_v39 }
 0x1b9   :  { %2117 = vmatmul.mubr.msk.f32.vlgmr.msra.gmra.mrb[0].mxu1 %vm507_vm7, %v484_v38  ;;  %v1952_v38 = vsel %vm832_vm10, 1.0, %v2542_v9 }
 0x1ba   :  { %2119 = vmatprep.mubr.msk.f32.mxu1 %vm507_vm7, %v485_v47  ;;  %2237 = vmatpush3.bf16.msk.msra.mxu1 %vm2821_vm6, %v2232_v62  ;;  %v825_v47 = vld [vmem:[%s3067_s12] sm:$0xff] }
 0x1bb   :  { %2240 = vmatprep.subr.msk.bf16.mxu1 %vm2821_vm6, %v2238_v1  ;;  %v2250_v49 = vpack.c.bf16 %v826_v48, %v825_v47 }
 0x1bd   :  { %2120 = vmatmul.mubr.msk.f32.gmra.mrb[2].mxu1 %vm507_vm7, %v486_v46  ;;  %v2244_v46 = vpack.c.bf16 %v828_v45, %v827_v44 }
 0x1bf   :  { %2246 = vmatprep.subr.msk.bf16.mxu0 %vm2821_vm6, %v2244_v46 }
 0x1c0   :  { %2249 = vmatpush3.bf16.msk.msra.mxu0 %vm2821_vm6, %v2244_v46 }
 0x1c1   :  { %2252 = vmatprep.subr.msk.bf16.mxu0 %vm2821_vm6, %v2250_v49 }
 0x28c   :  { %v2118_v6 = vpop.f32.mrb[0].mxu1 }
 0x28d   :  { %v712_v7 = vadd.f32 %v2118_v6, %v1945_v2  ;;  %v686_v8 = vpop.f32.mrb[1].mxu1 }
 0x28e   :  { %v711_v11 = vadd.f32 %v1945_v2, %v686_v8 }
 0x28f   :  { %v716_v13 = vmax.f32 %v712_v7, 0.0 }
 0x290   :  { %v715_v14 = vmax.f32 %v711_v11, 0.0  ;;  %v2121_v15 = vpop.f32.mrb[2].mxu1 }
 0x291   :  { %v813_v16 = vadd.f32 %v799_v10, %v716_v13  ;;  %v714_v17 = vadd.f32 %v2121_v15, %v1945_v2  ;;  %v696_v18 = vpop.f32.mrb[3].mxu1  ;;  %v1314_v13 = vld [vmem:[#allocation11 + $0x8] sm:$0xf] }
 0x292   :  { %v812_v20 = vadd.f32 %v794_v12, %v715_v14  ;;  %v713_v21 = vadd.f32 %v1945_v2, %v696_v18  ;;  %v1313_v12 = vld [vmem:[#allocation11] sm:$0xff]  ;;  %v1974_v18 = vld [vmem:[#allocation10] ss:$0 sm:$0xff] }
 0x293   :  { %v2883_v23 = vmax.f32 %v813_v16, 0.0  ;;  %v718_v24 = vmax.f32 %v714_v17, 0.0  ;;  %v2256_v14 = vpack.c.bf16 %v1314_v13, %v1313_v12  ;;  %v1311_v15 = vld [vmem:[%s3070_s15] sm:$0xff]  ;;  %v1312_v16 = vld [vmem:[%s3070_s15 + $0x8] sm:$0xf] }
 0x294   :  { %v2886_v25 = vmax.f32 %v812_v20, 0.0  ;;  %v717_v26 = vmax.f32 %v713_v21, 0.0  ;;  %v2262_v17 = vpack.c.bf16 %v1312_v16, %v1311_v15 }
 0x295   :  { %v815_v27 = vadd.f32 %v809_v19, %v718_v24  ;;  %v848_v32 = vrot.slane %v2883_v23, 6 }
 0x296   :  { %v847_v29 = vrot.slane %v2886_v25, 6  ;;  %v814_v30 = vadd.f32 %v804_v22, %v717_v26 }
 0x297   :  { %v2891_v33 = vmax.f32 %v815_v27, 0.0 }
 0x298   :  { %v2894_v34 = vmax.f32 %v814_v30, 0.0  ;;  %v858_v35 = vsel %vm846_vm9, 0.0, %v847_v29  ;;  %v849_v40 = vsel %vm846_vm9, %v847_v29, %v848_v32 }
 0x299   :  { %v859_v36 = vmul.f32 %v1951_v31, %v858_v35  ;;  %v852_v39 = vrot.slane %v2891_v33, 6 }
 0x29a   :  { %v850_v37 = vrot.slane %v2894_v34, 6 }
 0x29b   :  { %2134 = vmatprep.mubr.msk.f32.mxu1 %vm507_vm7, %v859_v36 }
 0x29c   :  { %2135 = vmatmul.mubr.msk.f32.vlgmr.msra.gmra.mrb[4].mxu1 %vm507_vm7, %v849_v40  ;;  %v851_v41 = vsel %vm846_vm9, %v848_v32, %v850_v37  ;;  %v853_v43 = vsel %vm846_vm9, %v850_v37, %v852_v39 }
 0x29d   :  { %2243 = vmatpush3.bf16.msk.msra.mxu1 %vm2821_vm6, %v2238_v1  ;;  %v861_v42 = vmul.f32 %v1952_v38, %v851_v41 }
 0x29e   :  { %2258 = vmatprep.subr.msk.bf16.mxu1 %vm2821_vm6, %v2256_v14 }
 0x29f   :  { %2137 = vmatprep.mubr.msk.f32.mxu1 %vm507_vm7, %v861_v42 }
 0x2a0   :  { %2138 = vmatmul.mubr.msk.f32.gmra.mrb[6].mxu1 %vm507_vm7, %v853_v43 }
 0x2a1   :  { %2144 = vmatprep.mubr.msk.f32.mxu1 %vm507_vm7, %v2886_v25 }
 0x2a4   :  { %2145 = vmatmul.mubr.msk.f32.vlgmr.msra.gmra.mrb[4].mxu1 %vm507_vm7, %v2883_v23 }
 0x2a5   :  { %2147 = vmatprep.mubr.msk.f32.mxu1 %vm507_vm7, %v2894_v34  ;;  %2261 = vmatpush3.bf16.msk.msra.mxu1 %vm2821_vm6, %v2256_v14 }
 0x2a6   :  { %2264 = vmatprep.subr.msk.bf16.mxu1 %vm2821_vm6, %v2262_v17 }
 0x2a8   :  { %2148 = vmatmul.mubr.msk.f32.gmra.mrb[6].mxu1 %vm507_vm7, %v2891_v33 }
 0x377   :  { %v2146_v51 = vpop.f32.mrb[4].mxu1 }
 0x378   :  { %v1066_v52 = vadd.f32 %v2146_v51, %v1963_v50  ;;  %v1040_v53 = vpop.f32.mrb[5].mxu1 }
 0x379   :  { %v1065_v54 = vadd.f32 %v1963_v50, %v1040_v53  ;;  %v1317_v53 = vld [vmem:[#allocation14 + $0x8] sm:$0xf] }
 0x37a   :  { %v1070_v55 = vmax.f32 %v1066_v52, 0.0  ;;  %v1316_v52 = vld [vmem:[#allocation14] sm:$0xff] }
 0x37b   :  { %v1069_v56 = vmax.f32 %v1065_v54, 0.0  ;;  %v2149_v57 = vpop.f32.mrb[6].mxu1  ;;  %v2274_v54 = vpack.c.bf16 %v1317_v53, %v1316_v52 }
 0x37c   :  { %v1078_v58 = vrot.slane %v1070_v55, 6  ;;  %v1068_v59 = vadd.f32 %v2149_v57, %v1963_v50  ;;  %v1050_v60 = vpop.f32.mrb[7].mxu1 }
 0x37d   :  { %v1077_v61 = vrot.slane %v1069_v56, 6  ;;  %v1067_v62 = vadd.f32 %v1963_v50, %v1050_v60  ;;  %v1319_v50 = vld [vmem:[%s3074_s19 + $0x8] sm:$0xf] }
 0x37e   :  { %v1072_v63 = vmax.f32 %v1068_v59, 0.0 }
 0x37f   :  { %v1079_v0 = vsel %vm846_vm9, %v1077_v61, %v1078_v58  ;;  %v1088_v1 = vsel %vm846_vm9, 0.0, %v1077_v61  ;;  %v1071_v2 = vmax.f32 %v1067_v62, 0.0 }
 0x380   :  { %v1089_v3 = vmul.f32 %v1951_v31, %v1088_v1  ;;  %v1082_v6 = vrot.slane %v1072_v63, 6 }
 0x381   :  { %v1080_v7 = vrot.slane %v1071_v2, 6 }
 0x382   :  { %2154 = vmatprep.mubr.msk.f32.mxu0 %vm507_vm7, %v1089_v3 }
 0x383   :  { %v1081_v8 = vsel %vm846_vm9, %v1078_v58, %v1080_v7  ;;  %2155 = vmatmul.mubr.msk.f32.vlgmr.msra.gmra.mrb[8].mxu0 %vm507_vm7, %v1079_v0  ;;  %v1083_v10 = vsel %vm846_vm9, %v1080_v7, %v1082_v6 }
 0x384   :  { %2255 = vmatpush3.bf16.msk.msra.mxu0 %vm2821_vm6, %v2250_v49  ;;  %v1091_v11 = vmul.f32 %v1952_v38, %v1081_v8 }
 0x386   :  { %2157 = vmatprep.mubr.msk.f32.mxu0 %vm507_vm7, %v1091_v11 }
 0x387   :  { %2158 = vmatmul.mubr.msk.f32.gmra.mrb[10].mxu0 %vm507_vm7, %v1083_v10 }
 0x388   :  { %2164 = vmatprep.mubr.msk.f32.mxu0 %vm507_vm7, %v1069_v56 }
 0x38b   :  { %2165 = vmatmul.mubr.msk.f32.vlgmr.msra.gmra.mrb[8].mxu0 %vm507_vm7, %v1070_v55  ;;  %v1987_v55 = vld [vmem:[#allocation13] ss:$0 sm:$0xff] }
 0x38c   :  { %2167 = vmatprep.mubr.msk.f32.mxu0 %vm507_vm7, %v1071_v2 }
 0x38f   :  { %2168 = vmatmul.mubr.msk.f32.gmra.mrb[10].mxu0 %vm507_vm7, %v1072_v63 }
 0x45e   :  { %v2166_v19 = vpop.f32.mrb[8].mxu0 }
 0x45f   :  { %v1296_v20 = vadd.f32 %v2166_v19, %v1974_v18  ;;  %v1270_v21 = vpop.f32.mrb[9].mxu0 }
 0x460   :  { %v1295_v22 = vadd.f32 %v1974_v18, %v1270_v21 }
 0x461   :  { %v1300_v24 = vmax.f32 %v1296_v20, 0.0  ;;  %v1998_v20 = vld [vmem:[#allocation16] ss:$0 sm:$0xff] }
 0x462   :  { %v1299_v26 = vmax.f32 %v1295_v22, 0.0  ;;  %v2169_v27 = vpop.f32.mrb[10].mxu0 }
 0x463   :  { %v1304_v29 = vadd.f32 %v1300_v24, %v2883_v23  ;;  %v1298_v30 = vadd.f32 %v2169_v27, %v1974_v18  ;;  %v1280_v31 = vpop.f32.mrb[11].mxu0  ;;  %v1975_v23 = vsel %vm1321_vm11, 1.0, %v2542_v9 }
 0x464   :  { %v1303_v32 = vadd.f32 %v1299_v26, %v2886_v25  ;;  %v1297_v35 = vadd.f32 %v1974_v18, %v1280_v31  ;;  %v1802_v18 = vld [vmem:[%s3076_s21 + $0x8] sm:$0xf] }
 0x465   :  { %v2963_v36 = vmax.f32 %v1304_v29, 0.0  ;;  %v1302_v37 = vmax.f32 %v1298_v30, 0.0 }
 0x466   :  { %v2966_v38 = vmax.f32 %v1303_v32, 0.0  ;;  %v1301_v39 = vmax.f32 %v1297_v35, 0.0 }
 0x467   :  { %v1306_v40 = vadd.f32 %v1302_v37, %v2891_v33  ;;  %v1338_v43 = vrot.slane %v2963_v36, 4  ;;  %v1976_v33 = vsel %vm1323_vm12, 1.0, %v2542_v9  ;;  %v1318_v9 = vld [vmem:[%s3074_s19] sm:$0xff] }
 0x468   :  { %v1337_v41 = vrot.slane %v2966_v38, 4  ;;  %v1305_v42 = vadd.f32 %v1301_v39, %v2894_v34  ;;  %v2268_v51 = vpack.c.bf16 %v1319_v50, %v1318_v9 }
 0x469   :  { %v2973_v25 = vmax.f32 %v1306_v40, 0.0 }
 0x46a   :  { %v2976_v44 = vmax.f32 %v1305_v42, 0.0  ;;  %v1348_v4 = vsel %vm520_vm4, 0.0, %v1337_v41  ;;  %v1339_v34 = vsel %vm520_vm4, %v1337_v41, %v1338_v43  ;;  %2270 = vmatprep.subr.msk.bf16.mxu0 %vm2821_vm6, %v2268_v51 }
 0x46b   :  { %v1349_v45 = vmul.f32 %v1975_v23, %v1348_v4  ;;  %v1342_v47 = vrot.slane %v2973_v25, 4  ;;  %2273 = vmatpush3.bf16.msk.msra.mxu0 %vm2821_vm6, %v2268_v51 }
 0x46c   :  { %v1340_v46 = vrot.slane %v2976_v44, 4  ;;  %2276 = vmatprep.subr.msk.bf16.mxu0 %vm2821_vm6, %v2274_v54 }
 0x46d   :  { %2174 = vmatprep.mubr.msk.f32.mxu1 %vm507_vm7, %v1349_v45 }
 0x46e   :  { %2175 = vmatmul.mubr.msk.f32.vlgmr.msra.gmra.mrb[8].mxu1 %vm507_vm7, %v1339_v34  ;;  %v1341_v48 = vsel %vm520_vm4, %v1338_v43, %v1340_v46  ;;  %v1343_v49 = vsel %vm520_vm4, %v1340_v46, %v1342_v47 }
 0x46f   :  { %2267 = vmatpush3.bf16.msk.msra.mxu1 %vm2821_vm6, %v2262_v17  ;;  %v1351_v5 = vmul.f32 %v1976_v33, %v1341_v48  ;;  %v1801_v17 = vld [vmem:[%s3076_s21] sm:$0xff] }
 0x470   :  { %v2280_v19 = vpack.c.bf16 %v1802_v18, %v1801_v17 }
 0x471   :  { %2177 = vmatprep.mubr.msk.f32.mxu1 %vm507_vm7, %v1351_v5 }
 0x472   :  { %2178 = vmatmul.mubr.msk.f32.gmra.mrb[10].mxu1 %vm507_vm7, %v1343_v49  ;;  %2282 = vmatprep.subr.msk.bf16.mxu1 %vm2821_vm6, %v2280_v19 }
 0x473   :  { %2184 = vmatprep.mubr.msk.f32.mxu1 %vm507_vm7, %v2966_v38 }
 0x476   :  { %2185 = vmatmul.mubr.msk.f32.vlgmr.msra.gmra.mrb[8].mxu1 %vm507_vm7, %v2963_v36 }
 0x477   :  { %2187 = vmatprep.mubr.msk.f32.mxu1 %vm507_vm7, %v2976_v44  ;;  %2285 = vmatpush3.bf16.msk.msra.mxu1 %vm2821_vm6, %v2280_v19 }
 0x47a   :  { %2188 = vmatmul.mubr.msk.f32.gmra.mrb[10].mxu1 %vm507_vm7, %v2973_v25 }
 0x549   :  { %v2186_v56 = vpop.f32.mrb[8].mxu1 }
 0x54a   :  { %v1556_v57 = vadd.f32 %v2186_v56, %v1987_v55  ;;  %v1530_v58 = vpop.f32.mrb[9].mxu1 }
 0x54b   :  { %v1555_v59 = vadd.f32 %v1987_v55, %v1530_v58 }
 0x54c   :  { %v1560_v60 = vmax.f32 %v1556_v57, 0.0 }
 0x54d   :  { %v1559_v61 = vmax.f32 %v1555_v59, 0.0  ;;  %v2189_v62 = vpop.f32.mrb[10].mxu1 }
 0x54e   :  { %v1568_v63 = vrot.slane %v1560_v60, 4  ;;  %v1558_v0 = vadd.f32 %v2189_v62, %v1987_v55  ;;  %v1540_v1 = vpop.f32.mrb[11].mxu1 }
 0x54f   :  { %v1567_v2 = vrot.slane %v1559_v61, 4  ;;  %v1557_v3 = vadd.f32 %v1987_v55, %v1540_v1 }
 0x550   :  { %v1562_v6 = vmax.f32 %v1558_v0, 0.0 }
 0x551   :  { %v1569_v7 = vsel %vm520_vm4, %v1567_v2, %v1568_v63  ;;  %v1578_v8 = vsel %vm520_vm4, 0.0, %v1567_v2  ;;  %v1561_v10 = vmax.f32 %v1557_v3, 0.0 }
 0x552   :  { %v1579_v11 = vmul.f32 %v1975_v23, %v1578_v8  ;;  %v1572_v12 = vrot.slane %v1562_v6, 4 }
 0x553   :  { %v1570_v13 = vrot.slane %v1561_v10, 4 }
 0x554   :  { %2194 = vmatprep.mubr.msk.f32.mxu0 %vm507_vm7, %v1579_v11 }
 0x555   :  { %v1571_v14 = vsel %vm520_vm4, %v1568_v63, %v1570_v13  ;;  %2195 = vmatmul.mubr.msk.f32.vlgmr.msra.gmra.mrb[12].mxu0 %vm507_vm7, %v1569_v7  ;;  %v1573_v15 = vsel %vm520_vm4, %v1570_v13, %v1572_v12 }
 0x556   :  { %2279 = vmatpush3.bf16.msk.msra.mxu0 %vm2821_vm6, %v2274_v54  ;;  %v1581_v16 = vmul.f32 %v1976_v33, %v1571_v14 }
 0x558   :  { %2197 = vmatprep.mubr.msk.f32.mxu0 %vm507_vm7, %v1581_v16 }
 0x559   :  { %2198 = vmatmul.mubr.msk.f32.gmra.mrb[14].mxu0 %vm507_vm7, %v1573_v15 }
 0x55a   :  { %2204 = vmatprep.mubr.msk.f32.mxu0 %vm507_vm7, %v1559_v61 }
 0x55d   :  { %2205 = vmatmul.mubr.msk.f32.vlgmr.msra.gmra.mrb[12].mxu0 %vm507_vm7, %v1560_v60 }
 0x55e   :  { %2207 = vmatprep.mubr.msk.f32.mxu0 %vm507_vm7, %v1561_v10 }
 0x561   :  { %2208 = vmatmul.mubr.msk.f32.gmra.mrb[14].mxu0 %vm507_vm7, %v1562_v6 }
 0x630   :  { %v2206_v21 = vpop.f32.mrb[12].mxu0 }
 0x631   :  { %v1786_v22 = vadd.f32 %v2206_v21, %v1998_v20  ;;  %v1760_v24 = vpop.f32.mrb[13].mxu0 }
 0x632   :  { %v1785_v26 = vadd.f32 %v1998_v20, %v1760_v24 }
 0x633   :  { %v1790_v27 = vmax.f32 %v1786_v22, 0.0 }
 0x634   :  { %v1789_v29 = vmax.f32 %v1785_v26, 0.0  ;;  %v2209_v30 = vpop.f32.mrb[14].mxu0 }
 0x635   :  { %v1794_v31 = vadd.f32 %v1790_v27, %v2963_v36  ;;  %v1788_v32 = vadd.f32 %v2209_v30, %v1998_v20  ;;  %v1770_v35 = vpop.f32.mrb[15].mxu0  ;;  %v1999_v36 = vld [vmem:[#allocation2] ss:$0 sm:$0xff] }
 0x636   :  { %v1793_v37 = vadd.f32 %v1789_v29, %v2966_v38  ;;  %v1787_v39 = vadd.f32 %v1998_v20, %v1770_v35 }
 0x637   :  { %v1792_v40 = vmax.f32 %v1788_v32, 0.0  ;;  %v1798_v28 = vmax.f32 %v1794_v31, 0.0 }
 0x638   :  { %v1797_v41 = vmax.f32 %v1793_v37, 0.0  ;;  %v1791_v42 = vmax.f32 %v1787_v39, 0.0 }
 0x639   :  { %v1796_v23 = vadd.f32 %v1792_v40, %v2973_v25 }
 0x63a   :  { %v1795_v43 = vadd.f32 %v1791_v42, %v2976_v44  ;;  %2214 = vmatprep.mubr.msk.f32.mxu1 %vm507_vm7, %v1797_v41 }
 0x63b   :  { %2215 = vmatmul.mubr.msk.f32.vlgmr.msra.gmra.mrb[12].mxu1 %vm507_vm7, %v1798_v28  ;;  %v1800_v45 = vmax.f32 %v1796_v23, 0.0 }
 0x63c   :  { %v1799_v4 = vmax.f32 %v1795_v43, 0.0 }
 0x63e   :  { %2217 = vmatprep.mubr.msk.f32.mxu1 %vm507_vm7, %v1799_v4 }
 0x63f   :  { %2218 = vmatmul.mubr.msk.f32.gmra.mrb[14].mxu1 %vm507_vm7, %v1800_v45 }
 0x70e   :  { %v2216_v38 = vpop.f32.mrb[12].mxu1 }
 0x70f   :  { %v1897_v46 = vadd.f32 %v2216_v38, %v1999_v36  ;;  %v1891_v33 = vpop.f32.mrb[13].mxu1 }
 0x710   :  { %v1892_v34 = vadd.f32 %v1999_v36, %v1891_v33 }
 0x711   :  { %1912 = vst.msk [vmem:[%s3078_s23 + $0x8] sm:$0xff] %vm1910_vm13, %v1897_v46 }
 0x712   :  { %1911 = vst.msk [vmem:[%s3078_s23] sm:$0xff] %vm1910_vm13, %v1892_v34  ;;  %v2219_v25 = vpop.f32.mrb[14].mxu1 }
 0x713   :  { %v1907_v44 = vadd.f32 %v2219_v25, %v1999_v36  ;;  %v1901_v47 = vpop.f32.mrb[15].mxu1 }
 0x714   :  { %v1902_v48 = vadd.f32 %v1999_v36, %v1901_v47 }
 0x715   :  { %1914 = vst.msk [vmem:[%s3078_s23 + $0x18] sm:$0xff] %vm1910_vm13, %v1907_v44 }
 0x716   :  { %1913 = vst.msk [vmem:[%s3078_s23 + $0x10] sm:$0xff] %vm1910_vm13, %v1902_v48 }
 0x717   :  { %1919 = vsyncpa [#allocation4], 1 }
 0x718   :  { %1920 = vsyncpa [#allocation6], 1 }
 0x719   :  { %1921 = vsyncpa [#allocation9], 1 }
 0x71a   :  { %1922 = vsyncpa [#allocation12], 1 }
 0x71b   :  { %1923 = vsyncpa [#allocation15], 1 }

</bundles_post_ra>
